<compile_context>
chip_gen: v7x
topology: tpu7x:2x2x1
jax: 0.10.0
libtpu: 0.0.40
codegen_flags: <defaults>
</compile_context>

<pallas_src>
import jax
import jax.numpy as jnp
from jax.experimental import pallas as pl
from jax.experimental.pallas import tpu as pltpu


def _lane_pad(c):
    return ((c + 127) // 128) * 128


# ---------------------------------------------------------------------------
# Stage 1: conv1 (1x1) -> BN -> ReLU, fused with the 27 per-offset weight
# products of the 3x3x3 conv:  g[j, k*Cmid + c] = (relu(f[j]@W1 + b1) @ W2[k])[c]
# Output is bf16 and lane-padded to 256 columns (lane-dense stores, half HBM).
# ---------------------------------------------------------------------------
def stage1_kernel(f_ref, w1_ref, b1_ref, w2c_ref, g_ref):
    h = jnp.dot(f_ref[...], w1_ref[...], preferred_element_type=jnp.float32)
    h = jnp.maximum(h + b1_ref[...], 0.0)
    g = jnp.dot(h, w2c_ref[...], preferred_element_type=jnp.float32)
    g_ref[...] = g.astype(g_ref.dtype)


# ---------------------------------------------------------------------------
# Stage 2: sparse 3x3x3 gather-accumulate (MXU one-hot gather, per-offset loop),
# BN shift + ReLU, then conv3 (1x1->BN->ReLU) and downsample (1x1->BN) fused
# into a single block-diagonal matmul, residual add.  Output channels padded
# to a multiple of 128 for lane-dense stores (sliced back in the wrapper).
# ---------------------------------------------------------------------------
def stage2_kernel(idx_ref, g_ref, f_ref, b2_ref, w23_ref, b3_ref, bd_ref, out_ref):
    tile, ks = idx_ref.shape
    n_src = g_ref.shape[0]
    cmid = b2_ref.shape[1]
    cpad = out_ref.shape[1]

    # Lane-iota over source points, built ONCE per tile and reused for all 27
    # offsets (the old code rebuilt a (27,TILE,N) iota every grid step).
    j_iota = jax.lax.broadcasted_iota(jnp.int32, (tile, n_src), 1)

    # conv2: statically-unrolled loop over the 27 kernel offsets.  Each step is
    # the natural [TILE,N] x [N,Cmid] MXU matmul (no transposed operands), the
    # one-hot is exact 0/1 in bf16, and absent neighbors (-1) never match so
    # they contribute exactly zero.  Accumulation stays in f32.
    acc = jnp.zeros((tile, cmid), jnp.float32)
    for k in range(ks):
        oh = (idx_ref[:, k:k + 1] == j_iota).astype(jnp.bfloat16)   # [TILE, N]
        hw_k = g_ref[:, k * cmid:(k + 1) * cmid]                    # [N, Cmid] bf16
        acc = acc + jnp.dot(oh, hw_k, preferred_element_type=jnp.float32)

    h2 = jnp.maximum(acc + b2_ref[...], 0.0)                        # BN shift + ReLU

    # conv3 + downsample as ONE MXU call: [TILE, Cmid+Cin] @ block-diag weight.
    # Column block [0:cpad] is conv3 (gets its own bias + ReLU), column block
    # [cpad:2*cpad] is the downsample (bias only) -- ReLU must not touch it.
    xcat = jnp.concatenate([h2, f_ref[...]], axis=1)
    y = jnp.dot(xcat, w23_ref[...], preferred_element_type=jnp.float32)
    main = jnp.maximum(y[:, :cpad] + b3_ref[...], 0.0)
    down = y[:, cpad:] + bd_ref[...]
    out_ref[...] = main + down


# ---------------------------------------------------------------------------
# Tile / VMEM planning (generation-aware, conservative for v7x's 64 MiB).
# ---------------------------------------------------------------------------
def _vmem_capacity_bytes():
    try:
        info = pltpu.get_tpu_info()
        cap = getattr(info, "vmem_capacity_bytes", None)
        if cap:
            return int(cap)
    except Exception:
        pass
    return 64 * 1024 * 1024          # conservative fallback = v7x physical VMEM


def _stage2_vmem_estimate(tile, n, cin, cmid, ks, kpad, cpad):
    resident_g = 2 * n * kpad * 2                                     # bf16 g (dbl-buffered)
    blocks = 2 * tile * (_lane_pad(ks) * 4 + _lane_pad(cin) * 4 + cpad * 4)
    scratch = (tile * n * (4 + 2)                                     # lane-iota + one one-hot
               + tile * 2 * cpad * 4 + tile * _lane_pad(cmid) * 4)    # fused matmul out + acc
    return resident_g + blocks + scratch


def _plan(n, cin, cmid, ks, kpad, cpad):
    budget = max(32 * 1024 * 1024,
                 min(_vmem_capacity_bytes() // 2, 64 * 1024 * 1024))
    for t in (1024, 512, 256, 128, 64, 32, 16, 8):
        if t <= n and n % t == 0:
            est = _stage2_vmem_estimate(t, n, cin, cmid, ks, kpad, cpad)
            if est <= budget:
                limit = min(budget, max(32 * 1024 * 1024, 2 * est))
                return t, limit
    raise ValueError("point count too large for the resident one-hot gather; "
                     "needs the TODO(synk) DMA row-gather path")


# ---------------------------------------------------------------------------
# Wrapper
# ---------------------------------------------------------------------------
def bottleneck_block(feats, idx, params):
    n, cin = feats.shape
    ks = idx.shape[1]                        # 27 kernel offsets
    cmid = params["w1"].shape[1]
    cout = params["w3"].shape[1]
    kpad = _lane_pad(ks * cmid)              # 216 -> 256 (lane-dense stage-1 out)
    cpad = _lane_pad(cout)                   # lane-dense final out
    tile, vmem_limit = _plan(n, cin, cmid, ks, kpad, cpad)
    grid = (n // tile,)

    # ---- host-side prep: fold BN scales into weights, build fused layouts ----
    w1f = params["w1"] * params["s1"]                            # [Cin, Cmid]
    w2f = params["w2"] * params["s2"]                            # fold s2 into out chans
    w2cat = jnp.transpose(w2f, (1, 0, 2)).reshape(cmid, ks * cmid)
    w2cat = jnp.pad(w2cat, ((0, 0), (0, kpad - ks * cmid)))      # zero-pad to 256 cols

    # conv3 + downsample block-diagonal weight (one MXU call in stage 2).
    w3s = params["w3"] * params["s3"]                            # [Cmid, Cout]
    wds = params["wd"] * params["sd"]                            # [Cin,  Cout]
    w23 = jnp.zeros((cmid + cin, 2 * cpad), jnp.float32)
    w23 = w23.at[:cmid, :cout].set(w3s)
    w23 = w23.at[cmid:, cpad:cpad + cout].set(wds)
    b3p = jnp.zeros((1, cpad), jnp.float32).at[:, :cout].set(params["b3"])
    bdp = jnp.zeros((1, cpad), jnp.float32).at[:, :cout].set(params["bd"])

    # ---- stage 1: conv1 + BN + ReLU + the 27 W2 products, tiled over points ----
    g = pl.pallas_call(
        stage1_kernel,
        out_shape=jax.ShapeDtypeStruct((n, kpad), jnp.bfloat16),
        grid=grid,
        in_specs=[pl.BlockSpec((tile, cin), lambda t: (t, 0)),
                  pl.BlockSpec((cin, cmid), lambda t: (0, 0)),
                  pl.BlockSpec((1, cmid), lambda t: (0, 0)),
                  pl.BlockSpec((cmid, kpad), lambda t: (0, 0))],
        out_specs=pl.BlockSpec((tile, kpad), lambda t: (t, 0)),
        compiler_params=pltpu.CompilerParams(
            dimension_semantics=("parallel",)),
    )(feats, w1f, params["b1"], w2cat)

    # ---- stage 2: gather-conv2 + fused conv3/downsample + residual, tiled ----
    out_pad = pl.pallas_call(
        stage2_kernel,
        out_shape=jax.ShapeDtypeStruct((n, cpad), jnp.float32),
        grid=grid,
        in_specs=[pl.BlockSpec((tile, ks), lambda t: (t, 0)),          # neighbor idx
                  pl.BlockSpec((n, kpad), lambda t: (0, 0)),           # g (VMEM-resident)
                  pl.BlockSpec((tile, cin), lambda t: (t, 0)),         # features (residual)
                  pl.BlockSpec((1, cmid), lambda t: (0, 0)),           # b2
                  pl.BlockSpec((cmid + cin, 2 * cpad), lambda t: (0, 0)),  # block-diag [w3|wd]
                  pl.BlockSpec((1, cpad), lambda t: (0, 0)),           # b3
                  pl.BlockSpec((1, cpad), lambda t: (0, 0))],          # bd
        out_specs=pl.BlockSpec((tile, cpad), lambda t: (t, 0)),
        compiler_params=pltpu.CompilerParams(
            dimension_semantics=("parallel",),
            vmem_limit_bytes=vmem_limit),
    )(idx.astype(jnp.int32), g, feats, params["b2"], w23, b3p, bdp)

    return out_pad[:, :cout]


# ---------------------------------------------------------------------------
# Host helpers + reference
# ---------------------------------------------------------------------------
def fold_bn(gamma, beta, mean, var, eps=1e-5):
    scale = gamma * jax.lax.rsqrt(var + eps)
    shift = beta - mean * scale
    return scale[None, :], shift[None, :]


def make_neighbor_idx(gx, gy, gz):
    """Dense-grid neighbor map for a 3x3x3 sparse conv (stride 1), -1 = absent."""
    rx, ry, rz = jnp.arange(gx), jnp.arange(gy), jnp.arange(gz)
    coords = jnp.stack(jnp.meshgrid(rx, ry, rz, indexing="ij"), -1).reshape(-1, 3)
    o = jnp.arange(-1, 2)
    offsets = jnp.stack(jnp.meshgrid(o, o, o, indexing="ij"), -1).reshape(-1, 3)
    nbr = coords[:, None, :] + offsets[None, :, :]           # [N, 27, 3]
    valid = ((nbr[..., 0] >= 0) & (nbr[..., 0] < gx) &
             (nbr[..., 1] >= 0) & (nbr[..., 1] < gy) &
             (nbr[..., 2] >= 0) & (nbr[..., 2] < gz))
    flat = (nbr[..., 0] * gy + nbr[..., 1]) * gz + nbr[..., 2]
    return jnp.where(valid, flat, -1).astype(jnp.int32)


def reference_forward(feats, idx, p):
    """Pure-JAX f32 reference of the module semantics (for correctness check)."""
    h = jnp.maximum(feats @ p["w1"] * p["s1"] + p["b1"], 0.0)
    h_pad = jnp.concatenate([h, jnp.zeros((1, h.shape[1]), h.dtype)], axis=0)
    gathered = h_pad[jnp.where(idx < 0, h.shape[0], idx)]    # [N, 27, Cmid]
    h2 = jnp.einsum("nkc,kcd->nd", gathered, p["w2"])
    h2 = jnp.maximum(h2 * p["s2"] + p["b2"], 0.0)
    h3 = jnp.maximum(h2 @ p["w3"] * p["s3"] + p["b3"], 0.0)
    res = feats @ p["wd"] * p["sd"] + p["bd"]
    return h3 + res


if __name__ == "__main__":
    key = jax.random.PRNGKey(0)
    keys = jax.random.split(key, 16)

    input_nc, output_nc, reduction = 16, 32, 4
    mid = output_nc // reduction                             # 8
    box = (8, 8, 8)
    n_points = box[0] * box[1] * box[2]                      # 512

    feats = jax.random.normal(keys[0], (n_points, input_nc), jnp.float32)
    idx = make_neighbor_idx(*box)

    def bn_params(k, c):
        k1, k2, k3, k4 = jax.random.split(k, 4)
        gamma = 1.0 + 0.1 * jax.random.normal(k1, (c,), jnp.float32)
        beta = 0.1 * jax.random.normal(k2, (c,), jnp.float32)
        mean = 0.1 * jax.random.normal(k3, (c,), jnp.float32)
        var = jax.random.uniform(k4, (c,), jnp.float32, 0.5, 1.5)
        return fold_bn(gamma, beta, mean, var)

    s1, b1 = bn_params(keys[1], mid)
    s2, b2 = bn_params(keys[2], mid)
    s3, b3 = bn_params(keys[3], output_nc)
    sd, bd = bn_params(keys[4], output_nc)

    params = dict(
        w1=0.3 * jax.random.normal(keys[5], (input_nc, mid), jnp.float32),
        w2=0.1 * jax.random.normal(keys[6], (27, mid, mid), jnp.float32),
        w3=0.3 * jax.random.normal(keys[7], (mid, output_nc), jnp.float32),
        wd=0.3 * jax.random.normal(keys[8], (input_nc, output_nc), jnp.float32),
        s1=s1, b1=b1, s2=s2, b2=b2, s3=s3, b3=b3, sd=sd, bd=bd,
    )

    out = jax.block_until_ready(bottleneck_block(feats, idx, params))
    ref = reference_forward(feats, idx, params)
    assert out.shape == (n_points, output_nc)
    # The stage-1 activations cross the stage boundary in bf16 (the one-hot
    # gather itself is exact), so the tolerance is loosened slightly vs f32.
    assert jnp.allclose(out, ref, rtol=2e-2, atol=2e-2), "mismatch vs reference"
    print("KERNEL_OK")
</pallas_src>

<mosaic_0001>
module attributes {stable_mosaic.version = 11 : i64} {
  func.func @stage1_kernel(%arg0: i32, %arg1: memref<512x16xf32, #tpu.memory_space<vmem>>, %arg2: memref<16x8xf32, #tpu.memory_space<vmem>>, %arg3: memref<1x8xf32, #tpu.memory_space<vmem>>, %arg4: memref<8x256xf32, #tpu.memory_space<vmem>>, %arg5: memref<512x256xbf16, #tpu.memory_space<vmem>>) attributes {dimension_semantics = [#tpu.dimension_semantics<parallel>], iteration_bounds = array<i64: 1>, scalar_prefetch = 0 : i64, scratch_operands = 0 : i64, tpu.core_type = #tpu.core_type<tc>, window_params = [{transform_indices = @transform_0, window_bounds = array<i64: 512, 16>}, {pipeline_mode = #tpu.pipeline_mode<synchronous>, transform_indices = @transform_1, window_bounds = array<i64: 16, 8>}, {pipeline_mode = #tpu.pipeline_mode<synchronous>, transform_indices = @transform_2, window_bounds = array<i64: 1, 8>}, {pipeline_mode = #tpu.pipeline_mode<synchronous>, transform_indices = @transform_3, window_bounds = array<i64: 8, 256>}, {transform_indices = @transform_4, window_bounds = array<i64: 512, 256>}]} {
    %c0 = arith.constant 0 : index
    %c0_0 = arith.constant 0 : index
    %0 = vector.load %arg1[%c0, %c0_0] : memref<512x16xf32, #tpu.memory_space<vmem>>, vector<512x16xf32>
    %c0_1 = arith.constant 0 : index
    %c0_2 = arith.constant 0 : index
    %1 = vector.load %arg2[%c0_1, %c0_2] : memref<16x8xf32, #tpu.memory_space<vmem>>, vector<16x8xf32>
    %cst = arith.constant dense<0.000000e+00> : vector<512x8xf32>
    %2 = tpu.matmul %0, %1, %cst {dimension_numbers = #tpu.dot_dimension_numbers<[1], [0], [0], [1], [0, 0, 1, 1], [], []>} : vector<512x16xf32>, vector<16x8xf32>, vector<512x8xf32> -> vector<512x8xf32>
    %c0_3 = arith.constant 0 : index
    %c0_4 = arith.constant 0 : index
    %3 = vector.load %arg3[%c0_3, %c0_4] : memref<1x8xf32, #tpu.memory_space<vmem>>, vector<1x8xf32>
    %4 = vector.broadcast %3 : vector<1x8xf32> to vector<512x8xf32>
    %5 = arith.addf %2, %4 : vector<512x8xf32>
    %cst_5 = arith.constant 0.000000e+00 : f32
    %6 = vector.broadcast %cst_5 : f32 to vector<512x8xf32>
    %7 = arith.maximumf %5, %6 : vector<512x8xf32>
    %c0_6 = arith.constant 0 : index
    %c0_7 = arith.constant 0 : index
    %8 = vector.load %arg4[%c0_6, %c0_7] : memref<8x256xf32, #tpu.memory_space<vmem>>, vector<8x256xf32>
    %cst_8 = arith.constant dense<0.000000e+00> : vector<512x256xf32>
    %9 = tpu.matmul %7, %8, %cst_8 {dimension_numbers = #tpu.dot_dimension_numbers<[1], [0], [0], [1], [0, 0, 1, 1], [], []>} : vector<512x8xf32>, vector<8x256xf32>, vector<512x256xf32> -> vector<512x256xf32>
    %10 = arith.truncf %9 : vector<512x256xf32> to vector<512x256xbf16>
    %c0_9 = arith.constant 0 : index
    %c0_10 = arith.constant 0 : index
    %11 = vector.load %arg5[%c0_9, %c0_10] : memref<512x256xbf16, #tpu.memory_space<vmem>>, vector<512x256xbf16>
    tpu.vector_store %arg5[%c0_9, %c0_10], %10 {strides = array<i32>} : memref<512x256xbf16, #tpu.memory_space<vmem>>, vector<512x256xbf16>,
    return
  }
  func.func @transform_0(%arg0: i32) -> (i32, i32) {
    %c0_i32 = arith.constant 0 : i32
    %c0_i32_0 = arith.constant 0 : i32
    return %arg0, %c0_i32 : i32, i32
  }
  func.func @transform_1(%arg0: i32) -> (i32, i32) {
    %c0_i32 = arith.constant 0 : i32
    %c0_i32_0 = arith.constant 0 : i32
    %c0_i32_1 = arith.constant 0 : i32
    return %c0_i32, %c0_i32_0 : i32, i32
  }
  func.func @transform_2(%arg0: i32) -> (i32, i32) {
    %c0_i32 = arith.constant 0 : i32
    %c0_i32_0 = arith.constant 0 : i32
    %c0_i32_1 = arith.constant 0 : i32
    return %c0_i32, %c0_i32_0 : i32, i32
  }
  func.func @transform_3(%arg0: i32) -> (i32, i32) {
    %c0_i32 = arith.constant 0 : i32
    %c0_i32_0 = arith.constant 0 : i32
    %c0_i32_1 = arith.constant 0 : i32
    return %c0_i32, %c0_i32_0 : i32, i32
  }
  func.func @transform_4(%arg0: i32) -> (i32, i32) {
    %c0_i32 = arith.constant 0 : i32
    %c0_i32_0 = arith.constant 0 : i32
    return %arg0, %c0_i32 : i32, i32
  }
}

</mosaic_0001>

<bundles_post_ra>
// kernel: tpu_custom_call.1
= control target key start
LH: loop header
LB: loop body
LE: loop exit
PB: predicated region body
PF: predicated region fallthrough
CT: control target
= control target key end

     0   :  { %vm91_vm0 = vcmask 130048   ;;  %s2885_s0 = inlined_call_operand.vmem [shape: f32[512,16], index: 0, kind: input, shape index: {}]   ;;  %s2886_s1 = inlined_call_operand.vmem [shape: f32[16,8], index: 1, kind: input, shape index: {}]   ;;  %s2887_s2 = inlined_call_operand.vmem [shape: f32[1,8], index: 2, kind: input, shape index: {}]   ;;  %s2888_s3 = inlined_call_operand.vmem [shape: f32[8,256], index: 3, kind: input, shape index: {}]   ;;  %s2889_s4 = inlined_call_operand.hbm [shape: bf16[512,256], index: 4, kind: output, shape index: {}]  }
   0x1   :  { %v82_v0 = vld [vmem:[%s2886_s1] sm:$0xff]  ;;  %v83_v1 = vld [vmem:[%s2886_s1 + $0x8] sm:$0xff]  ;;  %v20_v5 = vld [vmem:[%s2885_s0 + $0x10] sm:$0xff] }
   0x2   :  { %v18_v2 = vld [vmem:[%s2885_s0] sm:$0xff]  ;;  %v2264_v3 = vpack.c.bf16 %v83_v1, %v82_v0  ;;  %v19_v4 = vld [vmem:[%s2885_s0 + $0x8] sm:$0xff]  ;;  %v21_v6 = vld [vmem:[%s2885_s0 + $0x18] sm:$0xff] }
   0x3   :  { %2168 = vmatprep.mubr.msk.f32.mxu0 %vm91_vm0, %v18_v2  ;;  %v22_v7 = vld [vmem:[%s2885_s0 + $0x20] sm:$0xff]  ;;  %v23_v8 = vld [vmem:[%s2885_s0 + $0x28] sm:$0xff]  ;;  %v24_v9 = vld [vmem:[%s2885_s0 + $0x30] sm:$0xff] }
   0x4   :  { %2265 = vmatprep.subr.bf16.mxu0 %v2264_v3  ;;  %v25_v10 = vld [vmem:[%s2885_s0 + $0x38] sm:$0xff]  ;;  %v26_v11 = vld [vmem:[%s2885_s0 + $0x40] sm:$0xff]  ;;  %v27_v12 = vld [vmem:[%s2885_s0 + $0x48] sm:$0xff] }
   0x5   :  { %2267 = vmatpush3.bf16.msra.mxu0 %v2264_v3  ;;  %v28_v13 = vld [vmem:[%s2885_s0 + $0x50] sm:$0xff] }
   0x8   :  { %2169 = vmatmul.mubr.msk.f32.vlgmr.msra.gmra.mrb[0].mxu0 %vm91_vm0, %v19_v4 }
   0x9   :  { %2171 = vmatprep.mubr.msk.f32.mxu0 %vm91_vm0, %v20_v5 }
   0xc   :  { %2172 = vmatmul.mubr.msk.f32.gmra.mrb[2].mxu0 %vm91_vm0, %v21_v6 }
   0xd   :  { %2174 = vmatprep.mubr.msk.f32.mxu0 %vm91_vm0, %v22_v7 }
  0x10   :  { %2175 = vmatmul.mubr.msk.f32.gmra.mrb[4].mxu0 %vm91_vm0, %v23_v8 }
  0x11   :  { %2177 = vmatprep.mubr.msk.f32.mxu0 %vm91_vm0, %v24_v9 }
  0x14   :  { %2178 = vmatmul.mubr.msk.f32.gmra.mrb[6].mxu0 %vm91_vm0, %v25_v10 }
  0x15   :  { %2180 = vmatprep.mubr.msk.f32.mxu0 %vm91_vm0, %v26_v11 }
  0x16   :  { %9 = vsyncpa [#allocation3], 0  ;;  %v29_v14 = vld [vmem:[%s2885_s0 + $0x58] sm:$0xff]  ;;  %v30_v15 = vld [vmem:[%s2885_s0 + $0x60] sm:$0xff]  ;;  %v2298_v54 = vmov 0.0   ;;  %vm735_vm1 = vcmask 64512  }
  0x17   :  { %v31_v16 = vld [vmem:[%s2885_s0 + $0x68] sm:$0xff]  ;;  %v32_v17 = vld [vmem:[%s2885_s0 + $0x70] sm:$0xff]  ;;  %v33_v18 = vld [vmem:[%s2885_s0 + $0x78] sm:$0xff]  ;;  %1082 = vmatprep.mubr.f32.mxu1 %v2298_v54 }
  0x18   :  { %2181 = vmatmul.mubr.msk.f32.gmra.mrb[8].mxu0 %vm91_vm0, %v27_v12  ;;  %v34_v19 = vld [vmem:[%s2885_s0 + $0x80] sm:$0xff]  ;;  %v35_v20 = vld [vmem:[%s2885_s0 + $0x88] sm:$0xff]  ;;  %v36_v21 = vld [vmem:[%s2885_s0 + $0x90] sm:$0xff] }
  0x19   :  { %2183 = vmatprep.mubr.msk.f32.mxu0 %vm91_vm0, %v28_v13  ;;  %v37_v22 = vld [vmem:[%s2885_s0 + $0x98] sm:$0xff]  ;;  %v38_v23 = vld [vmem:[%s2885_s0 + $0xa0] sm:$0xff]  ;;  %v39_v24 = vld [vmem:[%s2885_s0 + $0xa8] sm:$0xff] }
  0x1a   :  { %v40_v25 = vld [vmem:[%s2885_s0 + $0xb0] sm:$0xff]  ;;  %v41_v26 = vld [vmem:[%s2885_s0 + $0xb8] sm:$0xff]  ;;  %v42_v27 = vld [vmem:[%s2885_s0 + $0xc0] sm:$0xff] }
  0x1b   :  { %v43_v28 = vld [vmem:[%s2885_s0 + $0xc8] sm:$0xff]  ;;  %v44_v29 = vld [vmem:[%s2885_s0 + $0xd0] sm:$0xff]  ;;  %v45_v30 = vld [vmem:[%s2885_s0 + $0xd8] sm:$0xff] }
  0x1c   :  { %2184 = vmatmul.mubr.msk.f32.gmra.mrb[10].mxu0 %vm91_vm0, %v29_v14  ;;  %v46_v31 = vld [vmem:[%s2885_s0 + $0xe0] sm:$0xff]  ;;  %v47_v32 = vld [vmem:[%s2885_s0 + $0xe8] sm:$0xff]  ;;  %v48_v33 = vld [vmem:[%s2885_s0 + $0xf0] sm:$0xff] }
  0x1d   :  { %2186 = vmatprep.mubr.msk.f32.mxu0 %vm91_vm0, %v30_v15  ;;  %v49_v34 = vld [vmem:[%s2885_s0 + $0xf8] sm:$0xff]  ;;  %v50_v35 = vld [vmem:[%s2885_s0 + $0x100] sm:$0xff]  ;;  %v51_v36 = vld [vmem:[%s2885_s0 + $0x108] sm:$0xff] }
  0x1e   :  { %v52_v37 = vld [vmem:[%s2885_s0 + $0x110] sm:$0xff]  ;;  %v53_v38 = vld [vmem:[%s2885_s0 + $0x118] sm:$0xff]  ;;  %v54_v39 = vld [vmem:[%s2885_s0 + $0x120] sm:$0xff] }
  0x1f   :  { %v55_v40 = vld [vmem:[%s2885_s0 + $0x128] sm:$0xff]  ;;  %v56_v41 = vld [vmem:[%s2885_s0 + $0x130] sm:$0xff]  ;;  %v57_v42 = vld [vmem:[%s2885_s0 + $0x138] sm:$0xff] }
  0x20   :  { %2187 = vmatmul.mubr.msk.f32.gmra.mrb[12].mxu0 %vm91_vm0, %v31_v16  ;;  %v58_v43 = vld [vmem:[%s2885_s0 + $0x140] sm:$0xff]  ;;  %v59_v44 = vld [vmem:[%s2885_s0 + $0x148] sm:$0xff]  ;;  %v60_v45 = vld [vmem:[%s2885_s0 + $0x150] sm:$0xff] }
  0x21   :  { %2189 = vmatprep.mubr.msk.f32.mxu0 %vm91_vm0, %v32_v17  ;;  %v61_v46 = vld [vmem:[%s2885_s0 + $0x158] sm:$0xff]  ;;  %v62_v47 = vld [vmem:[%s2885_s0 + $0x160] sm:$0xff]  ;;  %v63_v48 = vld [vmem:[%s2885_s0 + $0x168] sm:$0xff] }
  0x22   :  { %v64_v49 = vld [vmem:[%s2885_s0 + $0x170] sm:$0xff]  ;;  %v734_v50 = vld [vmem:[%s2888_s3 + $0x8] sm:$0xff]  ;;  %v733_v51 = vld [vmem:[%s2888_s3] sm:$0xff] }
  0x23   :  { %928 = vmatprep.subr.mxu0 %v734_v50  ;;  %2268 = vmatprep.subr.mxu1 %v734_v50  ;;  %v65_v52 = vld [vmem:[%s2885_s0 + $0x178] sm:$0xff]  ;;  %v66_v53 = vld [vmem:[%s2885_s0 + $0x180] sm:$0xff]  ;;  %v67_v55 = vld [vmem:[%s2885_s0 + $0x188] sm:$0xff] }
  0x24   :  { %2190 = vmatmul.mubr.msk.f32.gmra.mrb[14].mxu0 %vm91_vm0, %v33_v18  ;;  %2269 = vmatpush1.msra.mxu1 %v733_v51  ;;  %v68_v56 = vld [vmem:[%s2885_s0 + $0x190] sm:$0xff]  ;;  %v69_v57 = vld [vmem:[%s2885_s0 + $0x198] sm:$0xff]  ;;  %v70_v58 = vld [vmem:[%s2885_s0 + $0x1a0] sm:$0xff] }
  0x25   :  { %2192 = vmatprep.mubr.msk.f32.mxu0 %vm91_vm0, %v34_v19  ;;  %929 = vmatpush1.msra.mxu0 %v733_v51  ;;  %v71_v59 = vld [vmem:[%s2885_s0 + $0x1a8] sm:$0xff]  ;;  %v72_v60 = vld [vmem:[%s2885_s0 + $0x1b0] sm:$0xff]  ;;  %v73_v61 = vld [vmem:[%s2885_s0 + $0x1b8] sm:$0xff] }
  0x26   :  { %v74_v62 = vld [vmem:[%s2885_s0 + $0x1c0] sm:$0xff]  ;;  %v75_v63 = vld [vmem:[%s2885_s0 + $0x1c8] sm:$0xff]  ;;  %v76_v0 = vld [vmem:[%s2885_s0 + $0x1d0] sm:$0xff] }
  0x27   :  { %v77_v1 = vld [vmem:[%s2885_s0 + $0x1d8] sm:$0xff]  ;;  %v78_v2 = vld [vmem:[%s2885_s0 + $0x1e0] sm:$0xff]  ;;  %v79_v3 = vld [vmem:[%s2885_s0 + $0x1e8] sm:$0xff] }
  0x28   :  { %2193 = vmatmul.mubr.msk.f32.gmra.mrb[16].mxu0 %vm91_vm0, %v35_v20  ;;  %v80_v4 = vld [vmem:[%s2885_s0 + $0x1f0] sm:$0xff]  ;;  %v81_v5 = vld [vmem:[%s2885_s0 + $0x1f8] sm:$0xff]  ;;  %v2600_v6 = vld [vmem:[%s2887_s2] ss:$0 sm:$0xff]  ;;  %s2299_s0 = smov [#allocation2]  }
  0x29   :  { %2195 = vmatprep.mubr.msk.f32.mxu0 %vm91_vm0, %v36_v21  ;;  %s1830_s2 = sshll.u32 %s2299_s0, 4  ;;  %s1831_s2 = int_to_ptr.vmem [resolvable:$true] %s1830_s2 }
  0x2a   :  { %s2274_s16 = scalar_lea.vmem %s1831_s2, 8192  ;;  %p2279_p1 = scmp.lt.s32.totalorder %s1831_s2, %s1831_s2 }
  0x2b   :  { %p2275_p0 = scmp.ne.s32.totalorder %s1831_s2, %s2274_s16  ;;  %p2280_p2 = scmp.lt.s32.totalorder %s2274_s16, %s2274_s16 }
  0x2c   :  { %2196 = vmatmul.mubr.msk.f32.gmra.mrb[18].mxu0 %vm91_vm0, %v37_v22 }
  0x2d   :  { %2198 = vmatprep.mubr.msk.f32.mxu0 %vm91_vm0, %v38_v23  ;;  %p2281_p3 = por %p2280_p2, %p2279_p1 }
  0x2f   :  { %p2282_p4 = pnand %p2281_p3, %p2275_p0 }
  0x30   :  { %2199 = vmatmul.mubr.msk.f32.gmra.mrb[20].mxu0 %vm91_vm0, %v39_v24 }
  0x31   :  { %2201 = vmatprep.mubr.msk.f32.mxu0 %vm91_vm0, %v40_v25 }
  0x34   :  { %2202 = vmatmul.mubr.msk.f32.gmra.mrb[22].mxu0 %vm91_vm0, %v41_v26 }
  0x35   :  { %2204 = vmatprep.mubr.msk.f32.mxu0 %vm91_vm0, %v42_v27 }
  0x38   :  { %2205 = vmatmul.mubr.msk.f32.gmra.mrb[24].mxu0 %vm91_vm0, %v43_v28 }
  0x39   :  { %2207 = vmatprep.mubr.msk.f32.mxu0 %vm91_vm0, %v44_v29 }
  0x3c   :  { %2208 = vmatmul.mubr.msk.f32.gmra.mrb[26].mxu0 %vm91_vm0, %v45_v30 }
  0x3d   :  { %2210 = vmatprep.mubr.msk.f32.mxu0 %vm91_vm0, %v46_v31 }
  0x40   :  { %2211 = vmatmul.mubr.msk.f32.gmra.mrb[28].mxu0 %vm91_vm0, %v47_v32 }
  0x41   :  { %2213 = vmatprep.mubr.msk.f32.mxu0 %vm91_vm0, %v48_v33 }
  0x44   :  { %2214 = vmatmul.mubr.msk.f32.gmra.mrb[30].mxu0 %vm91_vm0, %v49_v34 }
  0x45   :  { %2216 = vmatprep.mubr.msk.f32.mxu0 %vm91_vm0, %v50_v35 }
  0x48   :  { %2217 = vmatmul.mubr.msk.f32.gmra.mrb[32].mxu0 %vm91_vm0, %v51_v36 }
  0x49   :  { %2219 = vmatprep.mubr.msk.f32.mxu0 %vm91_vm0, %v52_v37 }
  0x4c   :  { %2220 = vmatmul.mubr.msk.f32.gmra.mrb[34].mxu0 %vm91_vm0, %v53_v38 }
  0x4d   :  { %2222 = vmatprep.mubr.msk.f32.mxu0 %vm91_vm0, %v54_v39 }
  0x50   :  { %2223 = vmatmul.mubr.msk.f32.gmra.mrb[36].mxu0 %vm91_vm0, %v55_v40 }
  0x51   :  { %2225 = vmatprep.mubr.msk.f32.mxu0 %vm91_vm0, %v56_v41 }
  0x54   :  { %2226 = vmatmul.mubr.msk.f32.gmra.mrb[38].mxu0 %vm91_vm0, %v57_v42 }
  0x55   :  { %2228 = vmatprep.mubr.msk.f32.mxu0 %vm91_vm0, %v58_v43 }
  0x58   :  { %2229 = vmatmul.mubr.msk.f32.gmra.mrb[40].mxu0 %vm91_vm0, %v59_v44 }
  0x59   :  { %2231 = vmatprep.mubr.msk.f32.mxu0 %vm91_vm0, %v60_v45 }
  0x5c   :  { %2232 = vmatmul.mubr.msk.f32.gmra.mrb[42].mxu0 %vm91_vm0, %v61_v46 }
  0x5d   :  { %2234 = vmatprep.mubr.msk.f32.mxu0 %vm91_vm0, %v62_v47 }
  0x60   :  { %2235 = vmatmul.mubr.msk.f32.gmra.mrb[44].mxu0 %vm91_vm0, %v63_v48 }
  0x61   :  { %2237 = vmatprep.mubr.msk.f32.mxu0 %vm91_vm0, %v64_v49 }
  0x64   :  { %2238 = vmatmul.mubr.msk.f32.gmra.mrb[46].mxu0 %vm91_vm0, %v65_v52 }
  0x65   :  { %2240 = vmatprep.mubr.msk.f32.mxu0 %vm91_vm0, %v66_v53 }
  0x68   :  { %2241 = vmatmul.mubr.msk.f32.gmra.mrb[48].mxu0 %vm91_vm0, %v67_v55 }
  0x69   :  { %2243 = vmatprep.mubr.msk.f32.mxu0 %vm91_vm0, %v68_v56 }
  0x6c   :  { %2244 = vmatmul.mubr.msk.f32.gmra.mrb[50].mxu0 %vm91_vm0, %v69_v57 }
  0x6d   :  { %2246 = vmatprep.mubr.msk.f32.mxu0 %vm91_vm0, %v70_v58 }
  0x70   :  { %2247 = vmatmul.mubr.msk.f32.gmra.mrb[52].mxu0 %vm91_vm0, %v71_v59 }
  0x71   :  { %2249 = vmatprep.mubr.msk.f32.mxu0 %vm91_vm0, %v72_v60 }
  0x74   :  { %2250 = vmatmul.mubr.msk.f32.gmra.mrb[54].mxu0 %vm91_vm0, %v73_v61 }
  0x75   :  { %2252 = vmatprep.mubr.msk.f32.mxu0 %vm91_vm0, %v74_v62 }
  0x78   :  { %2253 = vmatmul.mubr.msk.f32.gmra.mrb[56].mxu0 %vm91_vm0, %v75_v63 }
  0x79   :  { %2255 = vmatprep.mubr.msk.f32.mxu0 %vm91_vm0, %v76_v0 }
  0x7c   :  { %2256 = vmatmul.mubr.msk.f32.gmra.mrb[58].mxu0 %vm91_vm0, %v77_v1 }
  0x7d   :  { %2258 = vmatprep.mubr.msk.f32.mxu0 %vm91_vm0, %v78_v2 }
  0x80   :  { %2259 = vmatmul.mubr.msk.f32.gmra.mrb[60].mxu0 %vm91_vm0, %v79_v3 }
  0x81   :  { %2261 = vmatprep.mubr.msk.f32.mxu0 %vm91_vm0, %v80_v4 }
  0x84   :  { %2262 = vmatmul.mubr.msk.f32.gmra.mrb[62].mxu0 %vm91_vm0, %v81_v5 }
  0x85   :  { %992 = vmatprep.mubr.f32.mxu0 %v2298_v54 }
  0xdb   :  { %v2170_v7 = vpop.f32.mrb[0].mxu0 }
  0xdc   :  { %v350_v8 = vpop.f32.mrb[1].mxu0  ;;  %v356_v10 = vadd.f32 %v2170_v7, %v2600_v6 }
  0xdd   :  { %v351_v9 = vadd.f32 %v2600_v6, %v350_v8 }
  0xde   :  { %v670_v14 = vmax.f32 %v356_v10, 0.0 }
  0xdf   :  { %v669_v11 = vmax.f32 %v351_v9, 0.0  ;;  %v2173_v12 = vpop.f32.mrb[2].mxu0 }
  0xe0   :  { %v360_v13 = vpop.f32.mrb[3].mxu0  ;;  %v366_v18 = vadd.f32 %v2173_v12, %v2600_v6 }
  0xe1   :  { %1906 = vmatmul.mubr.msk.f32.vlgmr.msra.gmra.mrb[64].mxu0 %vm735_vm1, %v669_v11  ;;  %v361_v15 = vadd.f32 %v2600_v6, %v360_v13 }
  0xe2   :  { %998 = vmatprep.mubr.f32.mxu0 %v2298_v54  ;;  %v672_v22 = vmax.f32 %v366_v18, 0.0 }
  0xe3   :  { %v2176_v16 = vpop.f32.mrb[4].mxu0  ;;  %v671_v19 = vmax.f32 %v361_v15, 0.0 }
  0xe4   :  { %v370_v17 = vpop.f32.mrb[5].mxu0  ;;  %v376_v26 = vadd.f32 %v2176_v16, %v2600_v6 }
  0xe5   :  { %1907 = vmatmul.mubr.msk.f32.gmra.mrb[66].mxu0 %vm735_vm1, %v670_v14  ;;  %v371_v23 = vadd.f32 %v2600_v6, %v370_v17 }
  0xe6   :  { %1004 = vmatprep.mubr.f32.mxu0 %v2298_v54  ;;  %v674_v30 = vmax.f32 %v376_v26, 0.0 }
  0xe7   :  { %v2179_v20 = vpop.f32.mrb[6].mxu0  ;;  %v673_v27 = vmax.f32 %v371_v23, 0.0 }
  0xe8   :  { %v380_v21 = vpop.f32.mrb[7].mxu0  ;;  %v386_v34 = vadd.f32 %v2179_v20, %v2600_v6 }
  0xe9   :  { %1908 = vmatmul.mubr.msk.f32.gmra.mrb[68].mxu0 %vm735_vm1, %v671_v19  ;;  %v381_v31 = vadd.f32 %v2600_v6, %v380_v21 }
  0xea   :  { %1010 = vmatprep.mubr.f32.mxu0 %v2298_v54  ;;  %v676_v40 = vmax.f32 %v386_v34, 0.0 }
  0xeb   :  { %v2182_v24 = vpop.f32.mrb[8].mxu0  ;;  %v675_v35 = vmax.f32 %v381_v31, 0.0 }
  0xec   :  { %v390_v25 = vpop.f32.mrb[9].mxu0  ;;  %v396_v45 = vadd.f32 %v2182_v24, %v2600_v6 }
  0xed   :  { %1909 = vmatmul.mubr.msk.f32.gmra.mrb[70].mxu0 %vm735_vm1, %v672_v22  ;;  %v391_v41 = vadd.f32 %v2600_v6, %v390_v25 }
  0xee   :  { %1016 = vmatprep.mubr.f32.mxu0 %v2298_v54  ;;  %v678_v52 = vmax.f32 %v396_v45, 0.0 }
  0xef   :  { %v2185_v28 = vpop.f32.mrb[10].mxu0  ;;  %v677_v46 = vmax.f32 %v391_v41, 0.0 }
  0xf0   :  { %v400_v29 = vpop.f32.mrb[11].mxu0  ;;  %v406_v59 = vadd.f32 %v2185_v28, %v2600_v6 }
  0xf1   :  { %1910 = vmatmul.mubr.msk.f32.gmra.mrb[72].mxu0 %vm735_vm1, %v673_v27  ;;  %v401_v53 = vadd.f32 %v2600_v6, %v400_v29 }
  0xf2   :  { %1022 = vmatprep.mubr.f32.mxu0 %v2298_v54  ;;  %v680_v1 = vmax.f32 %v406_v59, 0.0 }
  0xf3   :  { %v2188_v32 = vpop.f32.mrb[12].mxu0  ;;  %v679_v60 = vmax.f32 %v401_v53, 0.0 }
  0xf4   :  { %v410_v33 = vpop.f32.mrb[13].mxu0  ;;  %v416_v8 = vadd.f32 %v2188_v32, %v2600_v6 }
  0xf5   :  { %1911 = vmatmul.mubr.msk.f32.gmra.mrb[74].mxu0 %vm735_vm1, %v674_v30  ;;  %v411_v2 = vadd.f32 %v2600_v6, %v410_v33 }
  0xf6   :  { %1028 = vmatprep.mubr.f32.mxu0 %v2298_v54  ;;  %v682_v14 = vmax.f32 %v416_v8, 0.0 }
  0xf7   :  { %v2191_v36 = vpop.f32.mrb[14].mxu0  ;;  %v681_v9 = vmax.f32 %v411_v2, 0.0 }
  0xf8   :  { %v426_v37 = vadd.f32 %v2191_v36, %v2600_v6  ;;  %v2623_v38 = vpop.f32.mrb[15].mxu0 }
  0xf9   :  { %1912 = vmatmul.mubr.msk.f32.gmra.mrb[76].mxu0 %vm735_vm1, %v675_v35  ;;  %v421_v15 = vadd.f32 %v2600_v6, %v2623_v38 }
  0xfa   :  { %v684_v39 = vmax.f32 %v426_v37, 0.0  ;;  %1034 = vmatprep.mubr.f32.mxu0 %v2298_v54 }
  0xfb   :  { %v2194_v42 = vpop.f32.mrb[16].mxu0  ;;  %v683_v20 = vmax.f32 %v421_v15, 0.0 }
  0xfc   :  { %v430_v43 = vpop.f32.mrb[17].mxu0  ;;  %1921 = vmatmul.mubr.msk.f32.vlgmr.msra.gmra.mrb[0].mxu1 %vm735_vm1, %v684_v39  ;;  %v436_v47 = vadd.f32 %v2194_v42, %v2600_v6 }
  0xfd   :  { %v431_v44 = vadd.f32 %v2600_v6, %v430_v43  ;;  %1913 = vmatmul.mubr.msk.f32.gmra.mrb[78].mxu0 %vm735_vm1, %v676_v40  ;;  %1088 = vmatprep.mubr.f32.mxu1 %v2298_v54 }
  0xfe   :  { %1040 = vmatprep.mubr.f32.mxu0 %v2298_v54  ;;  %v686_v55 = vmax.f32 %v436_v47, 0.0 }
  0xff   :  { %v685_v48 = vmax.f32 %v431_v44, 0.0  ;;  %v2197_v49 = vpop.f32.mrb[18].mxu0 }
 0x100   :  { %v440_v50 = vpop.f32.mrb[19].mxu0  ;;  %v446_v61 = vadd.f32 %v2197_v49, %v2600_v6 }
 0x101   :  { %1914 = vmatmul.mubr.msk.f32.gmra.mrb[80].mxu0 %vm735_vm1, %v677_v46  ;;  %1922 = vmatmul.mubr.msk.f32.gmra.mrb[2].mxu1 %vm735_vm1, %v685_v48  ;;  %v441_v51 = vadd.f32 %v2600_v6, %v440_v50 }
 0x102   :  { %1046 = vmatprep.mubr.f32.mxu0 %v2298_v54  ;;  %1094 = vmatprep.mubr.f32.mxu1 %v2298_v54  ;;  %v688_v3 = vmax.f32 %v446_v61, 0.0 }
 0x103   :  { %v2200_v56 = vpop.f32.mrb[20].mxu0  ;;  %v687_v58 = vmax.f32 %v441_v51, 0.0 }
 0x104   :  { %v450_v57 = vpop.f32.mrb[21].mxu0  ;;  %v456_v10 = vadd.f32 %v2200_v56, %v2600_v6 }
 0x105   :  { %1915 = vmatmul.mubr.msk.f32.gmra.mrb[82].mxu0 %vm735_vm1, %v678_v52  ;;  %1923 = vmatmul.mubr.msk.f32.gmra.mrb[4].mxu1 %vm735_vm1, %v686_v55  ;;  %v451_v0 = vadd.f32 %v2600_v6, %v450_v57 }
 0x106   :  { %1052 = vmatprep.mubr.f32.mxu0 %v2298_v54  ;;  %1100 = vmatprep.mubr.f32.mxu1 %v2298_v54  ;;  %v690_v16 = vmax.f32 %v456_v10, 0.0 }
 0x107   :  { %v2203_v62 = vpop.f32.mrb[22].mxu0  ;;  %v689_v7 = vmax.f32 %v451_v0, 0.0 }
 0x108   :  { %v460_v63 = vpop.f32.mrb[23].mxu0  ;;  %v466_v21 = vadd.f32 %v2203_v62, %v2600_v6 }
 0x109   :  { %1916 = vmatmul.mubr.msk.f32.gmra.mrb[84].mxu0 %vm735_vm1, %v679_v60  ;;  %1924 = vmatmul.mubr.msk.f32.gmra.mrb[6].mxu1 %vm735_vm1, %v687_v58  ;;  %v461_v13 = vadd.f32 %v2600_v6, %v460_v63 }
 0x10a   :  { %1058 = vmatprep.mubr.f32.mxu0 %v2298_v54  ;;  %1106 = vmatprep.mubr.f32.mxu1 %v2298_v54  ;;  %v692_v25 = vmax.f32 %v466_v21, 0.0 }
 0x10b   :  { %v2206_v4 = vpop.f32.mrb[24].mxu0  ;;  %v691_v19 = vmax.f32 %v461_v13, 0.0 }
 0x10c   :  { %v470_v5 = vpop.f32.mrb[25].mxu0  ;;  %v476_v29 = vadd.f32 %v2206_v4, %v2600_v6 }
 0x10d   :  { %1917 = vmatmul.mubr.msk.f32.gmra.mrb[86].mxu0 %vm735_vm1, %v680_v1  ;;  %1925 = vmatmul.mubr.msk.f32.gmra.mrb[8].mxu1 %vm735_vm1, %v688_v3  ;;  %v471_v24 = vadd.f32 %v2600_v6, %v470_v5 }
 0x10e   :  { %1064 = vmatprep.mubr.f32.mxu0 %v2298_v54  ;;  %1112 = vmatprep.mubr.f32.mxu1 %v2298_v54  ;;  %v694_v33 = vmax.f32 %v476_v29, 0.0 }
 0x10f   :  { %v2209_v11 = vpop.f32.mrb[26].mxu0  ;;  %v693_v28 = vmax.f32 %v471_v24, 0.0 }
 0x110   :  { %v480_v12 = vpop.f32.mrb[27].mxu0  ;;  %v486_v37 = vadd.f32 %v2209_v11, %v2600_v6 }
 0x111   :  { %1918 = vmatmul.mubr.msk.f32.gmra.mrb[88].mxu0 %vm735_vm1, %v681_v9  ;;  %1926 = vmatmul.mubr.msk.f32.gmra.mrb[10].mxu1 %vm735_vm1, %v689_v7  ;;  %v481_v32 = vadd.f32 %v2600_v6, %v480_v12 }
 0x112   :  { %1070 = vmatprep.mubr.f32.mxu0 %v2298_v54  ;;  %1118 = vmatprep.mubr.f32.mxu1 %v2298_v54  ;;  %v696_v41 = vmax.f32 %v486_v37, 0.0 }
 0x113   :  { %v2212_v17 = vpop.f32.mrb[28].mxu0  ;;  %v695_v36 = vmax.f32 %v481_v32, 0.0 }
 0x114   :  { %v490_v18 = vpop.f32.mrb[29].mxu0  ;;  %v496_v45 = vadd.f32 %v2212_v17, %v2600_v6 }
 0x115   :  { %1919 = vmatmul.mubr.msk.f32.gmra.mrb[90].mxu0 %vm735_vm1, %v682_v14  ;;  %1927 = vmatmul.mubr.msk.f32.gmra.mrb[12].mxu1 %vm735_vm1, %v690_v16  ;;  %v491_v40 = vadd.f32 %v2600_v6, %v490_v18 }
 0x116   :  { %1076 = vmatprep.mubr.f32.mxu0 %v2298_v54  ;;  %1124 = vmatprep.mubr.f32.mxu1 %v2298_v54  ;;  %v698_v49 = vmax.f32 %v496_v45, 0.0 }
 0x117   :  { %v2215_v22 = vpop.f32.mrb[30].mxu0  ;;  %v697_v44 = vmax.f32 %v491_v40, 0.0 }
 0x118   :  { %v500_v23 = vpop.f32.mrb[31].mxu0  ;;  %v506_v53 = vadd.f32 %v2215_v22, %v2600_v6 }
 0x119   :  { %1920 = vmatmul.mubr.msk.f32.gmra.mrb[92].mxu0 %vm735_vm1, %v683_v20  ;;  %1928 = vmatmul.mubr.msk.f32.gmra.mrb[14].mxu1 %vm735_vm1, %v691_v19  ;;  %v501_v48 = vadd.f32 %v2600_v6, %v500_v23 }
 0x11a   :  { %1130 = vmatprep.mubr.f32.mxu1 %v2298_v54  ;;  %v700_v58 = vmax.f32 %v506_v53, 0.0 }
 0x11b   :  { %v2218_v26 = vpop.f32.mrb[32].mxu0  ;;  %v699_v52 = vmax.f32 %v501_v48, 0.0 }
 0x11c   :  { %v510_v27 = vpop.f32.mrb[33].mxu0  ;;  %v516_v62 = vadd.f32 %v2218_v26, %v2600_v6 }
 0x11d   :  { %1929 = vmatmul.mubr.msk.f32.gmra.mrb[16].mxu1 %vm735_vm1, %v692_v25  ;;  %v511_v57 = vadd.f32 %v2600_v6, %v510_v27 }
 0x11e   :  { %1136 = vmatprep.mubr.f32.mxu1 %v2298_v54  ;;  %v702_v2 = vmax.f32 %v516_v62, 0.0 }
 0x11f   :  { %v2221_v30 = vpop.f32.mrb[34].mxu0  ;;  %v701_v61 = vmax.f32 %v511_v57, 0.0 }
 0x120   :  { %v520_v31 = vpop.f32.mrb[35].mxu0  ;;  %v526_v7 = vadd.f32 %v2221_v30, %v2600_v6 }
 0x121   :  { %1930 = vmatmul.mubr.msk.f32.gmra.mrb[18].mxu1 %vm735_vm1, %v693_v28  ;;  %v521_v1 = vadd.f32 %v2600_v6, %v520_v31 }
 0x122   :  { %1142 = vmatprep.mubr.f32.mxu1 %v2298_v54  ;;  %v704_v11 = vmax.f32 %v526_v7, 0.0 }
 0x123   :  { %v2681_v34 = vpop.f32.mrb[36].mxu0  ;;  %v703_v5 = vmax.f32 %v521_v1, 0.0 }
 0x124   :  { %v530_v35 = vpop.f32.mrb[37].mxu0  ;;  %v536_v15 = vadd.f32 %v2681_v34, %v2600_v6 }
 0x125   :  { %1931 = vmatmul.mubr.msk.f32.gmra.mrb[20].mxu1 %vm735_vm1, %v694_v33  ;;  %v531_v10 = vadd.f32 %v2600_v6, %v530_v35 }
 0x126   :  { %1148 = vmatprep.mubr.f32.mxu1 %v2298_v54  ;;  %v706_v19 = vmax.f32 %v536_v15, 0.0 }
 0x127   :  { %v2686_v38 = vpop.f32.mrb[38].mxu0  ;;  %v705_v14 = vmax.f32 %v531_v10, 0.0 }
 0x128   :  { %v540_v39 = vpop.f32.mrb[39].mxu0  ;;  %v546_v23 = vadd.f32 %v2686_v38, %v2600_v6 }
 0x129   :  { %1932 = vmatmul.mubr.msk.f32.gmra.mrb[22].mxu1 %vm735_vm1, %v695_v36  ;;  %v541_v18 = vadd.f32 %v2600_v6, %v540_v39 }
 0x12a   :  { %1154 = vmatprep.mubr.f32.mxu1 %v2298_v54  ;;  %v708_v27 = vmax.f32 %v546_v23, 0.0 }
 0x12b   :  { %v2691_v42 = vpop.f32.mrb[40].mxu0  ;;  %v707_v22 = vmax.f32 %v541_v18, 0.0 }
 0x12c   :  { %v2693_v43 = vpop.f32.mrb[41].mxu0  ;;  %v556_v29 = vadd.f32 %v2691_v42, %v2600_v6 }
 0x12d   :  { %1933 = vmatmul.mubr.msk.f32.gmra.mrb[24].mxu1 %vm735_vm1, %v696_v41  ;;  %v551_v26 = vadd.f32 %v2600_v6, %v2693_v43 }
 0x12e   :  { %1160 = vmatprep.mubr.f32.mxu1 %v2298_v54  ;;  %v710_v31 = vmax.f32 %v556_v29, 0.0 }
 0x12f   :  { %v2698_v46 = vpop.f32.mrb[42].mxu0  ;;  %v709_v28 = vmax.f32 %v551_v26, 0.0 }
 0x130   :  { %v2700_v47 = vpop.f32.mrb[43].mxu0  ;;  %v566_v33 = vadd.f32 %v2698_v46, %v2600_v6 }
 0x131   :  { %1934 = vmatmul.mubr.msk.f32.gmra.mrb[26].mxu1 %vm735_vm1, %v697_v44  ;;  %v561_v30 = vadd.f32 %v2600_v6, %v2700_v47 }
 0x132   :  { %1166 = vmatprep.mubr.f32.mxu1 %v2298_v54  ;;  %v712_v35 = vmax.f32 %v566_v33, 0.0 }
 0x133   :  { %v2705_v50 = vpop.f32.mrb[44].mxu0  ;;  %v711_v32 = vmax.f32 %v561_v30, 0.0 }
 0x134   :  { %v2707_v51 = vpop.f32.mrb[45].mxu0  ;;  %v576_v37 = vadd.f32 %v2705_v50, %v2600_v6 }
 0x135   :  { %1935 = vmatmul.mubr.msk.f32.gmra.mrb[28].mxu1 %vm735_vm1, %v698_v49  ;;  %v571_v34 = vadd.f32 %v2600_v6, %v2707_v51 }
 0x136   :  { %1172 = vmatprep.mubr.f32.mxu1 %v2298_v54  ;;  %v714_v39 = vmax.f32 %v576_v37, 0.0 }
 0x137   :  { %v2712_v55 = vpop.f32.mrb[46].mxu0  ;;  %v713_v36 = vmax.f32 %v571_v34, 0.0 }
 0x138   :  { %v2714_v56 = vpop.f32.mrb[47].mxu0  ;;  %v586_v41 = vadd.f32 %v2712_v55, %v2600_v6 }
 0x139   :  { %1936 = vmatmul.mubr.msk.f32.gmra.mrb[30].mxu1 %vm735_vm1, %v699_v52  ;;  %v581_v38 = vadd.f32 %v2600_v6, %v2714_v56 }
 0x13a   :  { %1178 = vmatprep.mubr.f32.mxu1 %v2298_v54  ;;  %v716_v43 = vmax.f32 %v586_v41, 0.0 }
 0x13b   :  { %v2719_v59 = vpop.f32.mrb[48].mxu0  ;;  %v715_v40 = vmax.f32 %v581_v38, 0.0 }
 0x13c   :  { %v2721_v60 = vpop.f32.mrb[49].mxu0  ;;  %v596_v45 = vadd.f32 %v2719_v59, %v2600_v6 }
 0x13d   :  { %1937 = vmatmul.mubr.msk.f32.gmra.mrb[32].mxu1 %vm735_vm1, %v700_v58  ;;  %v591_v42 = vadd.f32 %v2600_v6, %v2721_v60 }
 0x13e   :  { %1184 = vmatprep.mubr.f32.mxu1 %v2298_v54  ;;  %v718_v47 = vmax.f32 %v596_v45, 0.0 }
 0x13f   :  { %v2726_v63 = vpop.f32.mrb[50].mxu0  ;;  %v717_v44 = vmax.f32 %v591_v42, 0.0 }
 0x140   :  { %v2728_v0 = vpop.f32.mrb[51].mxu0  ;;  %v606_v49 = vadd.f32 %v2726_v63, %v2600_v6 }
 0x141   :  { %1938 = vmatmul.mubr.msk.f32.gmra.mrb[34].mxu1 %vm735_vm1, %v701_v61  ;;  %v601_v46 = vadd.f32 %v2600_v6, %v2728_v0 }
 0x142   :  { %1190 = vmatprep.mubr.f32.mxu1 %v2298_v54  ;;  %v720_v51 = vmax.f32 %v606_v49, 0.0 }
 0x143   :  { %v2733_v3 = vpop.f32.mrb[52].mxu0  ;;  %v719_v48 = vmax.f32 %v601_v46, 0.0 }
 0x144   :  { %v2735_v4 = vpop.f32.mrb[53].mxu0  ;;  %v616_v53 = vadd.f32 %v2733_v3, %v2600_v6 }
 0x145   :  { %1939 = vmatmul.mubr.msk.f32.gmra.mrb[36].mxu1 %vm735_vm1, %v702_v2  ;;  %v611_v50 = vadd.f32 %v2600_v6, %v2735_v4 }
 0x146   :  { %1196 = vmatprep.mubr.f32.mxu1 %v2298_v54  ;;  %v722_v56 = vmax.f32 %v616_v53, 0.0 }
 0x147   :  { %v2740_v8 = vpop.f32.mrb[54].mxu0  ;;  %v721_v52 = vmax.f32 %v611_v50, 0.0 }
 0x148   :  { %v2742_v9 = vpop.f32.mrb[55].mxu0  ;;  %v626_v58 = vadd.f32 %v2740_v8, %v2600_v6 }
 0x149   :  { %1940 = vmatmul.mubr.msk.f32.gmra.mrb[38].mxu1 %vm735_vm1, %v703_v5  ;;  %v621_v55 = vadd.f32 %v2600_v6, %v2742_v9 }
 0x14a   :  { %1202 = vmatprep.mubr.f32.mxu1 %v2298_v54  ;;  %v724_v60 = vmax.f32 %v626_v58, 0.0 }
 0x14b   :  { %v2747_v12 = vpop.f32.mrb[56].mxu0  ;;  %v723_v57 = vmax.f32 %v621_v55, 0.0 }
 0x14c   :  { %v2749_v13 = vpop.f32.mrb[57].mxu0  ;;  %v636_v62 = vadd.f32 %v2747_v12, %v2600_v6 }
 0x14d   :  { %1941 = vmatmul.mubr.msk.f32.gmra.mrb[40].mxu1 %vm735_vm1, %v704_v11  ;;  %v631_v59 = vadd.f32 %v2600_v6, %v2749_v13 }
 0x14e   :  { %1208 = vmatprep.mubr.f32.mxu1 %v2298_v54  ;;  %v726_v0 = vmax.f32 %v636_v62, 0.0 }
 0x14f   :  { %v2755_v16 = vpop.f32.mrb[58].mxu0  ;;  %v725_v61 = vmax.f32 %v631_v59, 0.0 }
 0x150   :  { %v2757_v17 = vpop.f32.mrb[59].mxu0  ;;  %v646_v2 = vadd.f32 %v2755_v16, %v2600_v6 }
 0x151   :  { %1942 = vmatmul.mubr.msk.f32.gmra.mrb[42].mxu1 %vm735_vm1, %v705_v14  ;;  %v641_v63 = vadd.f32 %v2600_v6, %v2757_v17 }
 0x152   :  { %1214 = vmatprep.mubr.f32.mxu1 %v2298_v54  ;;  %v728_v4 = vmax.f32 %v646_v2, 0.0 }
 0x153   :  { %v2762_v20 = vpop.f32.mrb[60].mxu0  ;;  %v727_v1 = vmax.f32 %v641_v63, 0.0 }
 0x154   :  { %v2764_v21 = vpop.f32.mrb[61].mxu0  ;;  %v656_v7 = vadd.f32 %v2762_v20, %v2600_v6 }
 0x155   :  { %1943 = vmatmul.mubr.msk.f32.gmra.mrb[44].mxu1 %vm735_vm1, %v706_v19  ;;  %v651_v3 = vadd.f32 %v2600_v6, %v2764_v21 }
 0x156   :  { %1220 = vmatprep.mubr.f32.mxu1 %v2298_v54  ;;  %v730_v9 = vmax.f32 %v656_v7, 0.0 }
 0x157   :  { %v2770_v24 = vpop.f32.mrb[62].mxu0  ;;  %v729_v5 = vmax.f32 %v651_v3, 0.0 }
 0x158   :  { %v2772_v25 = vpop.f32.mrb[63].mxu0  ;;  %v666_v14 = vadd.f32 %v2770_v24, %v2600_v6 }
 0x159   :  { %1944 = vmatmul.mubr.msk.f32.gmra.mrb[46].mxu1 %vm735_vm1, %v707_v22  ;;  %v661_v8 = vadd.f32 %v2600_v6, %v2772_v25 }
 0x15a   :  { %1226 = vmatprep.mubr.f32.mxu1 %v2298_v54  ;;  %v732_v18 = vmax.f32 %v666_v14, 0.0 }
 0x15b   :  { %v731_v11 = vmax.f32 %v661_v8, 0.0 }
 0x15d   :  { %1945 = vmatmul.mubr.msk.f32.gmra.mrb[48].mxu1 %vm735_vm1, %v708_v27 }
 0x15e   :  { %1232 = vmatprep.mubr.f32.mxu1 %v2298_v54 }
 0x161   :  { %1946 = vmatmul.mubr.msk.f32.gmra.mrb[50].mxu1 %vm735_vm1, %v709_v28 }
 0x162   :  { %1238 = vmatprep.mubr.f32.mxu1 %v2298_v54 }
 0x165   :  { %1947 = vmatmul.mubr.msk.f32.gmra.mrb[52].mxu1 %vm735_vm1, %v710_v31 }
 0x166   :  { %1244 = vmatprep.mubr.f32.mxu1 %v2298_v54 }
 0x169   :  { %1948 = vmatmul.mubr.msk.f32.gmra.mrb[54].mxu1 %vm735_vm1, %v711_v32 }
 0x16a   :  { %1250 = vmatprep.mubr.f32.mxu1 %v2298_v54 }
 0x16d   :  { %1949 = vmatmul.mubr.msk.f32.gmra.mrb[56].mxu1 %vm735_vm1, %v712_v35 }
 0x16e   :  { %1256 = vmatprep.mubr.f32.mxu1 %v2298_v54 }
 0x171   :  { %1950 = vmatmul.mubr.msk.f32.gmra.mrb[58].mxu1 %vm735_vm1, %v713_v36 }
 0x172   :  { %1262 = vmatprep.mubr.f32.mxu1 %v2298_v54 }
 0x175   :  { %1951 = vmatmul.mubr.msk.f32.gmra.mrb[60].mxu1 %vm735_vm1, %v714_v39 }
 0x176   :  { %1268 = vmatprep.mubr.f32.mxu1 %v2298_v54 }
 0x179   :  { %1952 = vmatmul.mubr.msk.f32.gmra.mrb[62].mxu1 %vm735_vm1, %v715_v40 }
 0x17a   :  { %1274 = vmatprep.mubr.f32.mxu1 %v2298_v54 }
 0x17d   :  { %1953 = vmatmul.mubr.msk.f32.gmra.mrb[64].mxu1 %vm735_vm1, %v716_v43 }
 0x17e   :  { %1280 = vmatprep.mubr.f32.mxu1 %v2298_v54 }
 0x181   :  { %1954 = vmatmul.mubr.msk.f32.gmra.mrb[66].mxu1 %vm735_vm1, %v717_v44 }
 0x182   :  { %1286 = vmatprep.mubr.f32.mxu1 %v2298_v54 }
 0x185   :  { %1955 = vmatmul.mubr.msk.f32.gmra.mrb[68].mxu1 %vm735_vm1, %v718_v47 }
 0x186   :  { %1292 = vmatprep.mubr.f32.mxu1 %v2298_v54 }
 0x189   :  { %1956 = vmatmul.mubr.msk.f32.gmra.mrb[70].mxu1 %vm735_vm1, %v719_v48 }
 0x18a   :  { %1298 = vmatprep.mubr.f32.mxu1 %v2298_v54 }
 0x18d   :  { %1957 = vmatmul.mubr.msk.f32.gmra.mrb[72].mxu1 %vm735_vm1, %v720_v51 }
 0x18e   :  { %1304 = vmatprep.mubr.f32.mxu1 %v2298_v54 }
 0x191   :  { %1958 = vmatmul.mubr.msk.f32.gmra.mrb[74].mxu1 %vm735_vm1, %v721_v52 }
 0x192   :  { %1310 = vmatprep.mubr.f32.mxu1 %v2298_v54 }
 0x195   :  { %1959 = vmatmul.mubr.msk.f32.gmra.mrb[76].mxu1 %vm735_vm1, %v722_v56 }
 0x196   :  { %1316 = vmatprep.mubr.f32.mxu1 %v2298_v54 }
 0x199   :  { %1960 = vmatmul.mubr.msk.f32.gmra.mrb[78].mxu1 %vm735_vm1, %v723_v57 }
 0x19a   :  { %1322 = vmatprep.mubr.f32.mxu1 %v2298_v54 }
 0x19d   :  { %1961 = vmatmul.mubr.msk.f32.gmra.mrb[80].mxu1 %vm735_vm1, %v724_v60 }
 0x19e   :  { %1328 = vmatprep.mubr.f32.mxu1 %v2298_v54 }
 0x1a1   :  { %1962 = vmatmul.mubr.msk.f32.gmra.mrb[82].mxu1 %vm735_vm1, %v725_v61 }
 0x1a2   :  { %1334 = vmatprep.mubr.f32.mxu1 %v2298_v54 }
 0x1a5   :  { %1963 = vmatmul.mubr.msk.f32.gmra.mrb[84].mxu1 %vm735_vm1, %v726_v0 }
 0x1a6   :  { %1340 = vmatprep.mubr.f32.mxu1 %v2298_v54 }
 0x1a9   :  { %1964 = vmatmul.mubr.msk.f32.gmra.mrb[86].mxu1 %vm735_vm1, %v727_v1 }
 0x1aa   :  { %1346 = vmatprep.mubr.f32.mxu1 %v2298_v54 }
 0x1ad   :  { %1965 = vmatmul.mubr.msk.f32.gmra.mrb[88].mxu1 %vm735_vm1, %v728_v4 }
 0x1ae   :  { %1352 = vmatprep.mubr.f32.mxu1 %v2298_v54 }
 0x1b1   :  { %1966 = vmatmul.mubr.msk.f32.gmra.mrb[90].mxu1 %vm735_vm1, %v729_v5 }
 0x1b2   :  { %1358 = vmatprep.mubr.f32.mxu1 %v2298_v54 }
 0x1b4   :  { %v994_v10 = vpop.f32.mrb[64].mxu0 }
 0x1b5   :  { %v996_v12 = vpop.f32.mrb[65].mxu0  ;;  %1967 = vmatmul.mubr.msk.f32.gmra.mrb[92].mxu1 %vm735_vm1, %v730_v9 }
 0x1b6   :  { %v2034_v13 = vpack.c.bf16 %v996_v12, %v994_v10  ;;  %1364 = vmatprep.mubr.f32.mxu1 %v2298_v54 }
 0x1b8   :  { %1761 = vst [vmem:[#allocation2] sm:$0xff] %v2034_v13  ;;  %v1000_v15 = vpop.f32.mrb[66].mxu0 }
 0x1b9   :  { %v1002_v16 = vpop.f32.mrb[67].mxu0  ;;  %1968 = vmatmul.mubr.msk.f32.gmra.mrb[94].mxu1 %vm735_vm1, %v731_v11 }
 0x1ba   :  { %v2035_v17 = vpack.c.bf16 %v1002_v16, %v1000_v15  ;;  %1370 = vmatprep.mubr.f32.mxu1 %v2298_v54 }
 0x1bc   :  { %1762 = vst [vmem:[#allocation2 + $0x8] sm:$0xff] %v2035_v17  ;;  %v1006_v19 = vpop.f32.mrb[68].mxu0 }
 0x1bd   :  { %v1008_v20 = vpop.f32.mrb[69].mxu0  ;;  %1969 = vmatmul.mubr.msk.f32.gmra.mrb[96].mxu1 %vm735_vm1, %v732_v18 }
 0x1be   :  { %v2036_v21 = vpack.c.bf16 %v1008_v20, %v1006_v19 }
 0x1c0   :  { %1763 = vst [vmem:[#allocation2 + $0x10] sm:$0xff] %v2036_v21  ;;  %v1012_v22 = vpop.f32.mrb[70].mxu0 }
 0x1c1   :  { %v1014_v23 = vpop.f32.mrb[71].mxu0 }
 0x1c2   :  { %v2037_v25 = vpack.c.bf16 %v1014_v23, %v1012_v22 }
 0x1c4   :  { %1764 = vst [vmem:[#allocation2 + $0x18] sm:$0xff] %v2037_v25  ;;  %v1018_v6 = vpop.f32.mrb[72].mxu0 }
 0x1c5   :  { %v1020_v24 = vpop.f32.mrb[73].mxu0 }
 0x1c6   :  { %v2038_v26 = vpack.c.bf16 %v1020_v24, %v1018_v6 }
 0x1c8   :  { %1765 = vst [vmem:[#allocation2 + $0x20] sm:$0xff] %v2038_v26  ;;  %v1024_v27 = vpop.f32.mrb[74].mxu0 }
 0x1c9   :  { %v1026_v28 = vpop.f32.mrb[75].mxu0 }
 0x1ca   :  { %v2039_v29 = vpack.c.bf16 %v1026_v28, %v1024_v27 }
 0x1cc   :  { %1766 = vst [vmem:[#allocation2 + $0x28] sm:$0xff] %v2039_v29  ;;  %v1030_v54 = vpop.f32.mrb[76].mxu0 }
 0x1cd   :  { %v1032_v30 = vpop.f32.mrb[77].mxu0 }
 0x1ce   :  { %v2040_v31 = vpack.c.bf16 %v1032_v30, %v1030_v54 }
 0x1cf   :  { %v1084_v32 = vpop.f32.mrb[0].mxu1 }
 0x1d0   :  { %1767 = vst [vmem:[#allocation2 + $0x30] sm:$0xff] %v2040_v31  ;;  %v1036_v33 = vpop.f32.mrb[78].mxu0  ;;  %v1086_v34 = vpop.f32.mrb[1].mxu1 }
 0x1d1   :  { %v2049_v35 = vpack.c.bf16 %v1086_v34, %v1084_v32  ;;  %v1038_v36 = vpop.f32.mrb[79].mxu0 }
 0x1d2   :  { %v2041_v37 = vpack.c.bf16 %v1038_v36, %v1036_v33 }
 0x1d3   :  { %1776 = vst [vmem:[#allocation2 + $0x78] sm:$0xff] %v2049_v35 }
 0x1d4   :  { %1768 = vst [vmem:[#allocation2 + $0x38] sm:$0xff] %v2041_v37  ;;  %v1042_v38 = vpop.f32.mrb[80].mxu0  ;;  %v1090_v39 = vpop.f32.mrb[2].mxu1 }
 0x1d5   :  { %v1044_v40 = vpop.f32.mrb[81].mxu0  ;;  %v1092_v41 = vpop.f32.mrb[3].mxu1 }
 0x1d6   :  { %v2042_v42 = vpack.c.bf16 %v1044_v40, %v1042_v38  ;;  %v2050_v43 = vpack.c.bf16 %v1092_v41, %v1090_v39 }
 0x1d8   :  { %1769 = vst [vmem:[#allocation2 + $0x40] sm:$0xff] %v2042_v42  ;;  %1777 = vst [vmem:[#allocation2 + $0x80] sm:$0xff] %v2050_v43  ;;  %v1048_v44 = vpop.f32.mrb[82].mxu0  ;;  %v1096_v45 = vpop.f32.mrb[4].mxu1 }
 0x1d9   :  { %v1050_v46 = vpop.f32.mrb[83].mxu0  ;;  %v1098_v47 = vpop.f32.mrb[5].mxu1 }
 0x1da   :  { %v2043_v48 = vpack.c.bf16 %v1050_v46, %v1048_v44  ;;  %v2051_v49 = vpack.c.bf16 %v1098_v47, %v1096_v45 }
 0x1dc   :  { %1770 = vst [vmem:[#allocation2 + $0x48] sm:$0xff] %v2043_v48  ;;  %1778 = vst [vmem:[#allocation2 + $0x88] sm:$0xff] %v2051_v49  ;;  %v1054_v50 = vpop.f32.mrb[84].mxu0  ;;  %v1102_v51 = vpop.f32.mrb[6].mxu1 }
 0x1dd   :  { %v1056_v52 = vpop.f32.mrb[85].mxu0  ;;  %v1104_v53 = vpop.f32.mrb[7].mxu1 }
 0x1de   :  { %v2044_v55 = vpack.c.bf16 %v1056_v52, %v1054_v50  ;;  %v2052_v56 = vpack.c.bf16 %v1104_v53, %v1102_v51 }
 0x1e0   :  { %1771 = vst [vmem:[#allocation2 + $0x50] sm:$0xff] %v2044_v55  ;;  %1779 = vst [vmem:[#allocation2 + $0x90] sm:$0xff] %v2052_v56  ;;  %v1060_v57 = vpop.f32.mrb[86].mxu0  ;;  %v1108_v58 = vpop.f32.mrb[8].mxu1 }
 0x1e1   :  { %v1062_v59 = vpop.f32.mrb[87].mxu0  ;;  %v1110_v60 = vpop.f32.mrb[9].mxu1 }
 0x1e2   :  { %v2045_v61 = vpack.c.bf16 %v1062_v59, %v1060_v57  ;;  %v2053_v62 = vpack.c.bf16 %v1110_v60, %v1108_v58 }
 0x1e4   :  { %1772 = vst [vmem:[#allocation2 + $0x58] sm:$0xff] %v2045_v61  ;;  %1780 = vst [vmem:[#allocation2 + $0x98] sm:$0xff] %v2053_v62  ;;  %v1066_v63 = vpop.f32.mrb[88].mxu0  ;;  %v1114_v0 = vpop.f32.mrb[10].mxu1 }
 0x1e5   :  { %v1068_v1 = vpop.f32.mrb[89].mxu0  ;;  %v1116_v2 = vpop.f32.mrb[11].mxu1 }
 0x1e6   :  { %v2046_v3 = vpack.c.bf16 %v1068_v1, %v1066_v63  ;;  %v2054_v4 = vpack.c.bf16 %v1116_v2, %v1114_v0 }
 0x1e8   :  { %1773 = vst [vmem:[#allocation2 + $0x60] sm:$0xff] %v2046_v3  ;;  %1781 = vst [vmem:[#allocation2 + $0xa0] sm:$0xff] %v2054_v4  ;;  %v1072_v5 = vpop.f32.mrb[90].mxu0  ;;  %v1120_v7 = vpop.f32.mrb[12].mxu1 }
 0x1e9   :  { %v1074_v8 = vpop.f32.mrb[91].mxu0  ;;  %v1122_v9 = vpop.f32.mrb[13].mxu1 }
 0x1ea   :  { %v2047_v10 = vpack.c.bf16 %v1074_v8, %v1072_v5  ;;  %v2055_v11 = vpack.c.bf16 %v1122_v9, %v1120_v7 }
 0x1ec   :  { %1774 = vst [vmem:[#allocation2 + $0x68] sm:$0xff] %v2047_v10  ;;  %1782 = vst [vmem:[#allocation2 + $0xa8] sm:$0xff] %v2055_v11  ;;  %v1078_v12 = vpop.f32.mrb[92].mxu0  ;;  %v1126_v13 = vpop.f32.mrb[14].mxu1 }
 0x1ed   :  { %v1080_v14 = vpop.f32.mrb[93].mxu0  ;;  %v1128_v15 = vpop.f32.mrb[15].mxu1 }
 0x1ee   :  { %v2048_v16 = vpack.c.bf16 %v1080_v14, %v1078_v12  ;;  %v2056_v17 = vpack.c.bf16 %v1128_v15, %v1126_v13 }
 0x1f0   :  { %1775 = vst [vmem:[#allocation2 + $0x70] sm:$0xff] %v2048_v16  ;;  %1783 = vst [vmem:[#allocation2 + $0xb0] sm:$0xff] %v2056_v17  ;;  %v1132_v18 = vpop.f32.mrb[16].mxu1 }
 0x1f1   :  { %v1134_v19 = vpop.f32.mrb[17].mxu1 }
 0x1f2   :  { %v2057_v20 = vpack.c.bf16 %v1134_v19, %v1132_v18 }
 0x1f4   :  { %1784 = vst [vmem:[#allocation2 + $0xb8] sm:$0xff] %v2057_v20  ;;  %v1138_v21 = vpop.f32.mrb[18].mxu1 }
 0x1f5   :  { %v1140_v22 = vpop.f32.mrb[19].mxu1 }
 0x1f6   :  { %v2058_v23 = vpack.c.bf16 %v1140_v22, %v1138_v21 }
 0x1f8   :  { %1785 = vst [vmem:[#allocation2 + $0xc0] sm:$0xff] %v2058_v23  ;;  %v1144_v25 = vpop.f32.mrb[20].mxu1 }
 0x1f9   :  { %v1146_v6 = vpop.f32.mrb[21].mxu1 }
 0x1fa   :  { %v2059_v24 = vpack.c.bf16 %v1146_v6, %v1144_v25 }
 0x1fc   :  { %1786 = vst [vmem:[#allocation2 + $0xc8] sm:$0xff] %v2059_v24  ;;  %v1150_v26 = vpop.f32.mrb[22].mxu1 }
 0x1fd   :  { %v1152_v27 = vpop.f32.mrb[23].mxu1 }
 0x1fe   :  { %v2060_v28 = vpack.c.bf16 %v1152_v27, %v1150_v26 }
 0x200   :  { %1787 = vst [vmem:[#allocation2 + $0xd0] sm:$0xff] %v2060_v28  ;;  %v1156_v29 = vpop.f32.mrb[24].mxu1 }
 0x201   :  { %v1158_v54 = vpop.f32.mrb[25].mxu1 }
 0x202   :  { %v2061_v30 = vpack.c.bf16 %v1158_v54, %v1156_v29 }
 0x204   :  { %1788 = vst [vmem:[#allocation2 + $0xd8] sm:$0xff] %v2061_v30  ;;  %v1162_v31 = vpop.f32.mrb[26].mxu1 }
 0x205   :  { %v1164_v32 = vpop.f32.mrb[27].mxu1 }
 0x206   :  { %v2062_v33 = vpack.c.bf16 %v1164_v32, %v1162_v31 }
 0x208   :  { %1789 = vst [vmem:[#allocation2 + $0xe0] sm:$0xff] %v2062_v33  ;;  %v1168_v34 = vpop.f32.mrb[28].mxu1 }
 0x209   :  { %v1170_v35 = vpop.f32.mrb[29].mxu1 }
 0x20a   :  { %v2063_v36 = vpack.c.bf16 %v1170_v35, %v1168_v34 }
 0x20c   :  { %1790 = vst [vmem:[#allocation2 + $0xe8] sm:$0xff] %v2063_v36  ;;  %v1174_v37 = vpop.f32.mrb[30].mxu1 }
 0x20d   :  { %v1176_v38 = vpop.f32.mrb[31].mxu1 }
 0x20e   :  { %v2064_v39 = vpack.c.bf16 %v1176_v38, %v1174_v37 }
 0x210   :  { %1791 = vst [vmem:[#allocation2 + $0xf0] sm:$0xff] %v2064_v39  ;;  %v1180_v40 = vpop.f32.mrb[32].mxu1 }
 0x211   :  { %v1182_v41 = vpop.f32.mrb[33].mxu1 }
 0x212   :  { %v2065_v42 = vpack.c.bf16 %v1182_v41, %v1180_v40 }
 0x214   :  { %1792 = vst [vmem:[#allocation2 + $0xf8] sm:$0xff] %v2065_v42  ;;  %v1186_v43 = vpop.f32.mrb[34].mxu1 }
 0x215   :  { %v1188_v44 = vpop.f32.mrb[35].mxu1 }
 0x216   :  { %v2066_v45 = vpack.c.bf16 %v1188_v44, %v1186_v43 }
 0x218   :  { %1793 = vst [vmem:[#allocation2 + $0x100] sm:$0xff] %v2066_v45  ;;  %v1192_v46 = vpop.f32.mrb[36].mxu1 }
 0x219   :  { %v1194_v47 = vpop.f32.mrb[37].mxu1 }
 0x21a   :  { %v2067_v48 = vpack.c.bf16 %v1194_v47, %v1192_v46 }
 0x21c   :  { %1794 = vst [vmem:[#allocation2 + $0x108] sm:$0xff] %v2067_v48  ;;  %v1198_v49 = vpop.f32.mrb[38].mxu1 }
 0x21d   :  { %v1200_v50 = vpop.f32.mrb[39].mxu1 }
 0x21e   :  { %v2068_v51 = vpack.c.bf16 %v1200_v50, %v1198_v49 }
 0x220   :  { %1795 = vst [vmem:[#allocation2 + $0x110] sm:$0xff] %v2068_v51  ;;  %v1204_v52 = vpop.f32.mrb[40].mxu1 }
 0x221   :  { %v1206_v53 = vpop.f32.mrb[41].mxu1 }
 0x222   :  { %v2069_v55 = vpack.c.bf16 %v1206_v53, %v1204_v52 }
 0x224   :  { %1796 = vst [vmem:[#allocation2 + $0x118] sm:$0xff] %v2069_v55  ;;  %v1210_v56 = vpop.f32.mrb[42].mxu1 }
 0x225   :  { %v1212_v57 = vpop.f32.mrb[43].mxu1 }
 0x226   :  { %v2070_v58 = vpack.c.bf16 %v1212_v57, %v1210_v56 }
 0x228   :  { %1797 = vst [vmem:[#allocation2 + $0x120] sm:$0xff] %v2070_v58  ;;  %v1216_v59 = vpop.f32.mrb[44].mxu1 }
 0x229   :  { %v1218_v60 = vpop.f32.mrb[45].mxu1 }
 0x22a   :  { %v2071_v61 = vpack.c.bf16 %v1218_v60, %v1216_v59 }
 0x22c   :  { %1798 = vst [vmem:[#allocation2 + $0x128] sm:$0xff] %v2071_v61  ;;  %v1222_v62 = vpop.f32.mrb[46].mxu1 }
 0x22d   :  { %v1224_v63 = vpop.f32.mrb[47].mxu1 }
 0x22e   :  { %v2072_v0 = vpack.c.bf16 %v1224_v63, %v1222_v62 }
 0x230   :  { %1799 = vst [vmem:[#allocation2 + $0x130] sm:$0xff] %v2072_v0  ;;  %v1228_v1 = vpop.f32.mrb[48].mxu1 }
 0x231   :  { %v1230_v2 = vpop.f32.mrb[49].mxu1 }
 0x232   :  { %v2073_v3 = vpack.c.bf16 %v1230_v2, %v1228_v1 }
 0x234   :  { %1800 = vst [vmem:[#allocation2 + $0x138] sm:$0xff] %v2073_v3  ;;  %v1234_v4 = vpop.f32.mrb[50].mxu1 }
 0x235   :  { %v1236_v5 = vpop.f32.mrb[51].mxu1 }
 0x236   :  { %v2074_v7 = vpack.c.bf16 %v1236_v5, %v1234_v4 }
 0x238   :  { %1801 = vst [vmem:[#allocation2 + $0x140] sm:$0xff] %v2074_v7  ;;  %v1240_v8 = vpop.f32.mrb[52].mxu1 }
 0x239   :  { %v1242_v9 = vpop.f32.mrb[53].mxu1 }
 0x23a   :  { %v2075_v10 = vpack.c.bf16 %v1242_v9, %v1240_v8 }
 0x23c   :  { %1802 = vst [vmem:[#allocation2 + $0x148] sm:$0xff] %v2075_v10  ;;  %v1246_v11 = vpop.f32.mrb[54].mxu1 }
 0x23d   :  { %v1248_v12 = vpop.f32.mrb[55].mxu1 }
 0x23e   :  { %v2076_v13 = vpack.c.bf16 %v1248_v12, %v1246_v11 }
 0x240   :  { %1803 = vst [vmem:[#allocation2 + $0x150] sm:$0xff] %v2076_v13  ;;  %v1252_v14 = vpop.f32.mrb[56].mxu1 }
 0x241   :  { %v1254_v15 = vpop.f32.mrb[57].mxu1 }
 0x242   :  { %v2077_v16 = vpack.c.bf16 %v1254_v15, %v1252_v14 }
 0x244   :  { %1804 = vst [vmem:[#allocation2 + $0x158] sm:$0xff] %v2077_v16  ;;  %v1258_v17 = vpop.f32.mrb[58].mxu1 }
 0x245   :  { %v1260_v18 = vpop.f32.mrb[59].mxu1 }
 0x246   :  { %v2078_v19 = vpack.c.bf16 %v1260_v18, %v1258_v17 }
 0x248   :  { %1805 = vst [vmem:[#allocation2 + $0x160] sm:$0xff] %v2078_v19  ;;  %v1264_v20 = vpop.f32.mrb[60].mxu1 }
 0x249   :  { %v1266_v21 = vpop.f32.mrb[61].mxu1 }
 0x24a   :  { %v2079_v22 = vpack.c.bf16 %v1266_v21, %v1264_v20 }
 0x24c   :  { %1806 = vst [vmem:[#allocation2 + $0x168] sm:$0xff] %v2079_v22  ;;  %v1270_v23 = vpop.f32.mrb[62].mxu1 }
 0x24d   :  { %v1272_v25 = vpop.f32.mrb[63].mxu1 }
 0x24e   :  { %v2080_v6 = vpack.c.bf16 %v1272_v25, %v1270_v23 }
 0x250   :  { %1807 = vst [vmem:[#allocation2 + $0x170] sm:$0xff] %v2080_v6  ;;  %v1276_v24 = vpop.f32.mrb[64].mxu1 }
 0x251   :  { %v1278_v26 = vpop.f32.mrb[65].mxu1 }
 0x252   :  { %v2081_v27 = vpack.c.bf16 %v1278_v26, %v1276_v24 }
 0x254   :  { %1808 = vst [vmem:[#allocation2 + $0x178] sm:$0xff] %v2081_v27  ;;  %v1282_v28 = vpop.f32.mrb[66].mxu1 }
 0x255   :  { %v1284_v29 = vpop.f32.mrb[67].mxu1 }
 0x256   :  { %v2082_v54 = vpack.c.bf16 %v1284_v29, %v1282_v28 }
 0x258   :  { %1809 = vst [vmem:[#allocation2 + $0x180] sm:$0xff] %v2082_v54  ;;  %v1288_v30 = vpop.f32.mrb[68].mxu1 }
 0x259   :  { %v1290_v31 = vpop.f32.mrb[69].mxu1 }
 0x25a   :  { %v2083_v32 = vpack.c.bf16 %v1290_v31, %v1288_v30 }
 0x25c   :  { %1810 = vst [vmem:[#allocation2 + $0x188] sm:$0xff] %v2083_v32  ;;  %v1294_v33 = vpop.f32.mrb[70].mxu1 }
 0x25d   :  { %v1296_v34 = vpop.f32.mrb[71].mxu1 }
 0x25e   :  { %v2084_v35 = vpack.c.bf16 %v1296_v34, %v1294_v33 }
 0x260   :  { %1811 = vst [vmem:[#allocation2 + $0x190] sm:$0xff] %v2084_v35  ;;  %v1300_v36 = vpop.f32.mrb[72].mxu1 }
 0x261   :  { %v1302_v37 = vpop.f32.mrb[73].mxu1 }
 0x262   :  { %v2085_v38 = vpack.c.bf16 %v1302_v37, %v1300_v36 }
 0x264   :  { %1812 = vst [vmem:[#allocation2 + $0x198] sm:$0xff] %v2085_v38  ;;  %v1306_v39 = vpop.f32.mrb[74].mxu1 }
 0x265   :  { %v1308_v40 = vpop.f32.mrb[75].mxu1 }
 0x266   :  { %v2086_v41 = vpack.c.bf16 %v1308_v40, %v1306_v39 }
 0x268   :  { %1813 = vst [vmem:[#allocation2 + $0x1a0] sm:$0xff] %v2086_v41  ;;  %v1312_v42 = vpop.f32.mrb[76].mxu1 }
 0x269   :  { %v1314_v43 = vpop.f32.mrb[77].mxu1 }
 0x26a   :  { %v2087_v44 = vpack.c.bf16 %v1314_v43, %v1312_v42 }
 0x26c   :  { %1814 = vst [vmem:[#allocation2 + $0x1a8] sm:$0xff] %v2087_v44  ;;  %v1318_v45 = vpop.f32.mrb[78].mxu1 }
 0x26d   :  { %v1320_v46 = vpop.f32.mrb[79].mxu1 }
 0x26e   :  { %v2088_v47 = vpack.c.bf16 %v1320_v46, %v1318_v45 }
 0x270   :  { %1815 = vst [vmem:[#allocation2 + $0x1b0] sm:$0xff] %v2088_v47  ;;  %v1324_v48 = vpop.f32.mrb[80].mxu1 }
 0x271   :  { %v1326_v49 = vpop.f32.mrb[81].mxu1 }
 0x272   :  { %v2089_v50 = vpack.c.bf16 %v1326_v49, %v1324_v48 }
 0x274   :  { %1816 = vst [vmem:[#allocation2 + $0x1b8] sm:$0xff] %v2089_v50  ;;  %v1330_v51 = vpop.f32.mrb[82].mxu1 }
 0x275   :  { %v1332_v52 = vpop.f32.mrb[83].mxu1 }
 0x276   :  { %v2090_v53 = vpack.c.bf16 %v1332_v52, %v1330_v51 }
 0x278   :  { %1817 = vst [vmem:[#allocation2 + $0x1c0] sm:$0xff] %v2090_v53  ;;  %v1336_v55 = vpop.f32.mrb[84].mxu1 }
 0x279   :  { %v1338_v56 = vpop.f32.mrb[85].mxu1 }
 0x27a   :  { %v2091_v57 = vpack.c.bf16 %v1338_v56, %v1336_v55 }
 0x27c   :  { %1818 = vst [vmem:[#allocation2 + $0x1c8] sm:$0xff] %v2091_v57  ;;  %v1342_v58 = vpop.f32.mrb[86].mxu1 }
 0x27d   :  { %v1344_v59 = vpop.f32.mrb[87].mxu1 }
 0x27e   :  { %v2092_v60 = vpack.c.bf16 %v1344_v59, %v1342_v58 }
 0x280   :  { %1819 = vst [vmem:[#allocation2 + $0x1d0] sm:$0xff] %v2092_v60  ;;  %v1348_v61 = vpop.f32.mrb[88].mxu1 }
 0x281   :  { %v1350_v62 = vpop.f32.mrb[89].mxu1 }
 0x282   :  { %v2093_v63 = vpack.c.bf16 %v1350_v62, %v1348_v61 }
 0x284   :  { %1820 = vst [vmem:[#allocation2 + $0x1d8] sm:$0xff] %v2093_v63  ;;  %v1354_v0 = vpop.f32.mrb[90].mxu1 }
 0x285   :  { %v1356_v1 = vpop.f32.mrb[91].mxu1 }
 0x286   :  { %v2094_v2 = vpack.c.bf16 %v1356_v1, %v1354_v0 }
 0x288   :  { %1821 = vst [vmem:[#allocation2 + $0x1e0] sm:$0xff] %v2094_v2  ;;  %v1360_v3 = vpop.f32.mrb[92].mxu1 }
 0x289   :  { %v1362_v4 = vpop.f32.mrb[93].mxu1 }
 0x28a   :  { %v2095_v5 = vpack.c.bf16 %v1362_v4, %v1360_v3 }
 0x28c   :  { %1822 = vst [vmem:[#allocation2 + $0x1e8] sm:$0xff] %v2095_v5  ;;  %v1366_v7 = vpop.f32.mrb[94].mxu1 }
 0x28d   :  { %v1368_v8 = vpop.f32.mrb[95].mxu1 }
 0x28e   :  { %v2096_v9 = vpack.c.bf16 %v1368_v8, %v1366_v7 }
 0x290   :  { %1823 = vst [vmem:[#allocation2 + $0x1f0] sm:$0xff] %v2096_v9  ;;  %v1372_v10 = vpop.f32.mrb[96].mxu1 }
 0x291   :  { %v1374_v11 = vpop.f32.mrb[97].mxu1 }
 0x292   :  { %v2097_v12 = vpack.c.bf16 %v1374_v11, %v1372_v10 }
 0x294   :  { %1824 = vst [vmem:[#allocation2 + $0x1f8] sm:$0xff] %v2097_v12 }
 0x295   :  { %2285 = shalt.err (!%p2282_p4)
}
 0x296   :  { %s2286_s19 = scalar_lea.hbm %s2889_s4, 8192 }
 0x297   :  { %p2287_p5 = scmp.ne.s32.totalorder %s2889_s4, %s2286_s19  ;;  %p2290_p6 = scmp.lt.u32.totalorder %s2286_s19, %s2889_s4 }
 0x299   :  { %p2292_p7 = pnand %p2290_p6, %p2287_p5 }
 0x29b   :  { %2295 = shalt.err (!%p2292_p7)
}
 0x29c   :  { %s2300_s24 = smov 128   ;;  %s2301_s1 = smov 8  }
 0x29d   :  { %1836 = dma.vmem_to_hbm [thread:$0]  %s1831_s2, 8192, %s2889_s4, [#allocation3], %s2300_s24, %s2300_s24, %s2301_s1  }
 0x29e   :  { %2296 = dma.done.wait [#allocation3], 8192  }
 0x29f   :  { %2297 = vsyncadd [#allocation3], 4294959104 }
 0x2a0   :  { %1840 = vsyncpa [#allocation3], 1 }

</bundles_post_ra>
